<compile_context>
chip_gen: v6e
topology: v6e:2x2x1
jax: 0.10.0
libtpu: 0.0.40
codegen_flags: <defaults>
</compile_context>

<pallas_src>
import jax
import jax.numpy as jnp
from jax.experimental import pallas as pl
from jax.experimental.pallas import tpu as pltpu


def _adaptive_aux_loss_kernel(main_ref, aux_ref, w_ref, out_ref):
    # scalar fused multiply-add on the scalar (SMEM) path: out = main + w * aux
    out_ref[0] = main_ref[0] + w_ref[0] * aux_ref[0]


@jax.jit
def _forward_jit(main_loss, aux_loss, aux_weight):
    """Single-dispatch forward: casts + pallas_call + scalar extract, all fused."""
    main1 = jnp.reshape(jnp.asarray(main_loss, jnp.float32), (1,))
    aux1 = jnp.reshape(jnp.asarray(aux_loss, jnp.float32), (1,))
    w1 = jnp.reshape(jnp.asarray(aux_weight, jnp.float32), (1,))

    smem_spec = pl.BlockSpec(memory_space=pltpu.SMEM)
    total = pl.pallas_call(
        _adaptive_aux_loss_kernel,
        out_shape=jax.ShapeDtypeStruct((1,), jnp.float32),
        in_specs=[smem_spec, smem_spec, smem_spec],
        out_specs=smem_spec,
    )(main1, aux1, w1)

    # shape-() result; the slice is fused into the same executable (no extra gather op)
    return total[0]


def adaptive_aux_loss_forward(main_loss, aux_loss, aux_weight):
    """Pallas implementation of AdaptiveAuxiliaryLoss.forward.

    Args:
      main_loss:  scalar loss (python float or shape-() / (1,) array)
      aux_loss:   scalar loss (python float or shape-() / (1,) array)
      aux_weight: python float (host-cached parameter value)

    Returns:
      (total_loss: shape-() f32 device array, aux_weight_value: python float)
      NOTE: no device->host sync happens here; the float is the cached host value,
      matching the PyTorch `.item()` semantics without stalling the dispatch queue.
    """
    w = float(aux_weight)
    total = _forward_jit(main_loss, aux_loss, w)
    return total, w


class AdaptiveAuxiliaryLoss:
    """JAX/Pallas port of the PyTorch module (forward hot path in Pallas, jitted)."""

    def __init__(self, initial_weight=0.1, patience=5, min_weight=0.01, max_weight=0.5):
        # aux_weight kept host-side as a Python float (hyperparameter-like scalar);
        # it is passed into the jitted forward as a traced argument each call.
        self.aux_weight = float(initial_weight)
        self.patience = patience
        self.min_weight = min_weight
        self.max_weight = max_weight
        self.best_main_metric = float("inf")
        self.patience_counter = 0
        self.main_metric_history = []
        self.prev_main_metric = None
        self.moving_average = 0.0
        self.beta = 0.9

    def update_weight(self, main_metric, aux_metric=None):
        # Pure Python epoch-end bookkeeping (no kernel, no device buffers created).
        self.moving_average = self.beta * self.moving_average + (1 - self.beta) * main_metric
        self.main_metric_history.append(main_metric)
        if len(self.main_metric_history) > 5:
            self.main_metric_history.pop(0)
        w = self.aux_weight
        if self.prev_main_metric is not None:
            relative_change = (self.moving_average - self.prev_main_metric) / self.prev_main_metric
            if relative_change > 0.02:
                w *= 0.85
            elif relative_change < -0.01:
                if w < self.max_weight:
                    w *= 1.05
        if main_metric < self.best_main_metric:
            self.best_main_metric = main_metric
            self.patience_counter = 0
        else:
            self.patience_counter += 1
            if self.patience_counter >= self.patience:
                w *= 0.9
                self.patience_counter = 0
        w = min(max(w, self.min_weight), self.max_weight)
        self.aux_weight = w
        self.prev_main_metric = self.moving_average
        return w

    def __call__(self, main_loss, aux_loss):
        return adaptive_aux_loss_forward(main_loss, aux_loss, self.aux_weight)


if __name__ == "__main__":
    key = jax.random.PRNGKey(0)
    k1, k2 = jax.random.split(key)
    # small deterministic scalar losses (e.g. the mean of a batch of per-sample losses)
    main_loss = jnp.abs(jax.random.normal(k1, (), jnp.float32))
    aux_loss = jnp.abs(jax.random.normal(k2, (), jnp.float32))

    module = AdaptiveAuxiliaryLoss(initial_weight=0.1)

    # first forward
    total, w_val = module(main_loss, aux_loss)
    total = jax.block_until_ready(total)
    expected = float(main_loss) + 0.1 * float(aux_loss)
    assert abs(float(total) - expected) < 1e-5, (float(total), expected)
    assert abs(w_val - 0.1) < 1e-7

    # exercise the host-side weight update + a second forward
    # (new weight value must NOT trigger a retrace or a host sync in forward)
    module.update_weight(main_metric=1.0)
    module.update_weight(main_metric=0.5)
    total2, w_val2 = module(main_loss, aux_loss)
    total2 = jax.block_until_ready(total2)
    expected2 = float(main_loss) + w_val2 * float(aux_loss)
    assert abs(float(total2) - expected2) < 1e-5, (float(total2), expected2)

    print("KERNEL_OK")
</pallas_src>

<mosaic_0001>
module attributes {stable_mosaic.version = 11 : i64} {
  func.func @_adaptive_aux_loss_kernel(%arg0: memref<1xf32, #tpu.memory_space<smem>>, %arg1: memref<1xf32, #tpu.memory_space<smem>>, %arg2: memref<1xf32, #tpu.memory_space<smem>>, %arg3: memref<1xf32, #tpu.memory_space<smem>>) attributes {dimension_semantics = [], scalar_prefetch = 0 : i64, scratch_operands = 0 : i64, tpu.core_type = #tpu.core_type<tc>} {
    %c0 = arith.constant 0 : index
    %0 = memref.load %arg0[%c0] : memref<1xf32, #tpu.memory_space<smem>>
    %c0_0 = arith.constant 0 : index
    %1 = memref.load %arg2[%c0_0] : memref<1xf32, #tpu.memory_space<smem>>
    %c0_1 = arith.constant 0 : index
    %2 = memref.load %arg1[%c0_1] : memref<1xf32, #tpu.memory_space<smem>>
    %3 = arith.mulf %1, %2 : f32
    %4 = arith.addf %0, %3 : f32
    %c0_2 = arith.constant 0 : index
    %5 = memref.load %arg3[%c0_2] : memref<1xf32, #tpu.memory_space<smem>>
    memref.store %4, %arg3[%c0_2] : memref<1xf32, #tpu.memory_space<smem>>
    return
  }
}

</mosaic_0001>

<bundles_post_ra>
// kernel: _forward_jit.1
= control target key start
LH: loop header
LB: loop body
LE: loop exit
PB: predicated region body
PF: predicated region fallthrough
CT: control target
= control target key end

     0   :  { %11 = vsyncpa [#allocation6], 0  ;;  %s49_s20 = smov [#allocation5]   ;;  %s82_s0 = inlined_call_operand.<no memory space> [shape: f32[1], index: 0, kind: input, shape index: {}]   ;;  %s83_s1 = inlined_call_operand.<no memory space> [shape: f32[1], index: 1, kind: input, shape index: {}]   ;;  %s84_s2 = inlined_call_operand.<no memory space> [shape: f32[1], index: 2, kind: input, shape index: {}]   ;;  %s85_s3 = inlined_call_operand.hbm [shape: f32[1], index: 3, kind: output, shape index: {}]  }
   0x1   :  { %s21_s16 = smul.f32 %s84_s2, %s83_s1 }
   0x3   :  { %s22_s19 = sadd.f32 %s21_s16, %s82_s0 }
   0x5   :  { %24 = sst [smem:[#allocation5]] %s22_s19 }
   0x6   :  { %32 = dma.smem_to_hbm %s49_s20, 16, %s85_s3, [#allocation6]  }
   0x7   :  { %47 = dma.done.wait [#allocation6], 16  }
   0x8   :  { %48 = vsyncadd [#allocation6], 4294967280 }
   0x9   :  { %36 = sfence }
   0xa   :  { %37 = vsyncpa [#allocation6], 1 }

</bundles_post_ra>
